<compile_context>
chip_gen: v6e
topology: v6e:2x2x1
jax: 0.10.0
libtpu: 0.0.40
codegen_flags: <defaults>
</compile_context>

<pallas_src>
import functools

import jax
import jax.numpy as jnp
from jax import lax
from jax.experimental import pallas as pl
from jax.experimental.pallas import tpu as pltpu


def _round_up(x, m):
    return (x + m - 1) // m * m


def _focal_tversky_kernel(logits_ref, labels_ref, acc_ref, *,
                          ignore_index, hw, tile_p, need_mask):
    """Per-tile hot path.

    logits_ref: (C, TP) float  -- one batch element, TP flattened pixels.
    labels_ref: (1, TP) int32
    acc_ref:    (2, TP) float32 output block, resident across the pixel axis.
                row 0 accumulates sum(valid * softmax(logits)[label]),
                row 1 accumulates sum(valid).
    """
    i = pl.program_id(1)

    @pl.when(i == 0)
    def _():
        acc_ref[...] = jnp.zeros_like(acc_ref)

    logits = logits_ref[...].astype(jnp.float32)             # (C, TP)
    labels = labels_ref[...]                                  # (1, TP) int32

    # Numerically-stable softmax over the channel (sublane) axis; only the
    # probability at the label channel is materialised.
    m = jnp.max(logits, axis=0, keepdims=True)                # (1, TP)  XLU
    e = jnp.exp(logits - m)                                   # (C, TP)  EUP
    denom = jnp.sum(e, axis=0, keepdims=True)                 # (1, TP)  XLU

    class_idx = lax.broadcasted_iota(jnp.int32, logits.shape, 0)
    onehot = labels == class_idx                              # one-hot (expandLabels)
    num = jnp.sum(jnp.where(onehot, e, 0.0), axis=0, keepdims=True)

    p_label = num * pl.reciprocal(denom, approx=False)        # one divide / pixel

    valid = labels != ignore_index                            # ignore_index mask
    if need_mask:
        # Ragged last tile: mask lanes past the real pixel count (the partial
        # block's tail contains undefined VMEM data; jnp.where kills it).
        lane = lax.broadcasted_iota(jnp.int32, labels.shape, 1)
        valid = jnp.logical_and(valid, i * tile_p + lane < hw)

    tp_lane = jnp.where(valid, p_label, 0.0)                  # (1, TP)
    cnt_lane = valid.astype(jnp.float32)                      # (1, TP)

    # row 0: per-lane true positives, row 1: per-lane valid-pixel count.
    acc_ref[...] += jnp.concatenate([tp_lane, cnt_lane], axis=0)


def focal_tversky_loss(logits_nchw, labels_nhw, *, num_classes, smooth=1.0,
                       alpha=0.7, gamma=0.8, ignore_index=255, tile_p=8192):
    """FocalTverskyLoss forward. logits: (N,C,H,W) float, labels: (N,H,W) int."""
    N, C, H, W = logits_nchw.shape
    assert C == num_classes, "channel dim must equal num_classes"
    HW = H * W

    # Lane tile: multiple of 128, capped so one (C, tile) f32 block is ~<=2 MiB
    # (double-buffered inputs fit easily in scoped VMEM), and no larger than
    # the 128-rounded pixel count.
    vmem_cap = max(128, (2 * 1024 * 1024 // (C * 4)) // 128 * 128)
    tile_p_eff = max(128, min(_round_up(int(tile_p), 128), vmem_cap,
                              _round_up(HW, 128)))
    n_tiles = pl.cdiv(HW, tile_p_eff)
    need_mask = (HW % tile_p_eff) != 0

    # Free reshapes -- no transpose, no padding copy, no extra HBM pass.
    logits_ncp = logits_nchw.reshape(N, C, HW)
    labels_n1p = labels_nhw.reshape(N, 1, HW).astype(jnp.int32)

    kernel = functools.partial(_focal_tversky_kernel,
                               ignore_index=int(ignore_index),
                               hw=HW, tile_p=tile_p_eff, need_mask=need_mask)

    acc = pl.pallas_call(
        kernel,
        out_shape=jax.ShapeDtypeStruct((N, 2, tile_p_eff), jnp.float32),
        grid_spec=pltpu.PrefetchScalarGridSpec(
            num_scalar_prefetch=0,
            grid=(N, n_tiles),
            in_specs=[
                pl.BlockSpec((pl.Squeezed(), C, tile_p_eff),
                             lambda n, i: (n, 0, i)),
                pl.BlockSpec((pl.Squeezed(), 1, tile_p_eff),
                             lambda n, i: (n, 0, i)),
            ],
            out_specs=pl.BlockSpec((pl.Squeezed(), 2, tile_p_eff),
                                   lambda n, i: (n, 0, 0)),
        ),
        compiler_params=pltpu.CompilerParams(
            dimension_semantics=("parallel", "arbitrary")),
    )(logits_ncp, labels_n1p)

    # Single cross-lane reduction, once, outside the hot loop.
    tp = jnp.sum(acc[:, 0, :])
    n_valid = jnp.sum(acc[:, 1, :])

    # For softmax probs and one-hot targets: fn = fp = n_valid - tp (exact).
    fn = n_valid - tp
    fp = n_valid - tp
    ti = (tp + smooth) / (tp + alpha * fn + (1.0 - alpha) * fp + smooth)
    return jnp.power(1.0 - ti, gamma)


def _reference_loss(logits, labels, num_classes, smooth=1.0, alpha=0.7,
                    gamma=0.8, ignore_index=255):
    """Pure-JAX reference mirroring the PyTorch semantics."""
    probs = jax.nn.softmax(logits, axis=1)                                   # (N,C,H,W)
    onehot = (labels[:, None, :, :] ==
              jnp.arange(num_classes)[None, :, None, None]).astype(jnp.float32)
    ignored = (labels == ignore_index)[:, None, :, :]
    y_true = jnp.where(ignored, float(ignore_index), onehot)                 # expandLabels
    yt = y_true.reshape(-1)
    yp = probs.reshape(-1)
    mask = (yt != ignore_index).astype(jnp.float32)
    tp = jnp.sum(mask * yt * yp)
    fn = jnp.sum(mask * yt * (1.0 - yp))
    fp = jnp.sum(mask * (1.0 - yt) * yp)
    ti = (tp + smooth) / (tp + alpha * fn + (1.0 - alpha) * fp + smooth)
    return jnp.power(1.0 - ti, gamma)


if __name__ == "__main__":
    num_classes = 4
    ignore_index = 255
    key = jax.random.PRNGKey(0)

    # Case 1: pixel count is a multiple of the lane tile (no in-kernel mask).
    N, C, H, W = 2, num_classes, 16, 16
    k1, k2, k3, k4, k5, k6 = jax.random.split(key, 6)
    logits = jax.random.normal(k1, (N, C, H, W), dtype=jnp.float32)
    labels = jax.random.randint(k2, (N, H, W), 0, num_classes)
    labels = jnp.where(jax.random.bernoulli(k3, 0.1, (N, H, W)),
                       ignore_index, labels).astype(jnp.int32)

    loss = focal_tversky_loss(logits, labels, num_classes=num_classes,
                              smooth=1.0, alpha=0.7, gamma=0.8,
                              ignore_index=ignore_index)
    loss = jax.block_until_ready(loss)
    ref = _reference_loss(logits, labels, num_classes, smooth=1.0, alpha=0.7,
                          gamma=0.8, ignore_index=ignore_index)
    assert jnp.allclose(loss, ref, rtol=1e-5, atol=1e-6), (loss, ref)

    # Case 2: ragged pixel count (exercises the partial-block index mask).
    N2, H2, W2 = 2, 16, 15
    logits2 = jax.random.normal(k4, (N2, C, H2, W2), dtype=jnp.float32)
    labels2 = jax.random.randint(k5, (N2, H2, W2), 0, num_classes)
    labels2 = jnp.where(jax.random.bernoulli(k6, 0.1, (N2, H2, W2)),
                        ignore_index, labels2).astype(jnp.int32)

    loss2 = focal_tversky_loss(logits2, labels2, num_classes=num_classes,
                               smooth=1.0, alpha=0.7, gamma=0.8,
                               ignore_index=ignore_index)
    loss2 = jax.block_until_ready(loss2)
    ref2 = _reference_loss(logits2, labels2, num_classes, smooth=1.0, alpha=0.7,
                           gamma=0.8, ignore_index=ignore_index)
    assert jnp.allclose(loss2, ref2, rtol=1e-5, atol=1e-6), (loss2, ref2)

    print("KERNEL_OK")
</pallas_src>

<mosaic_0001>
module attributes {stable_mosaic.version = 11 : i64} {
  func.func @_focal_tversky_kernel(%arg0: i32, %arg1: i32, %arg2: memref<1x4x256xf32, #tpu.memory_space<vmem>>, %arg3: memref<1x1x256xi32, #tpu.memory_space<vmem>>, %arg4: memref<1x2x256xf32, #tpu.memory_space<vmem>>) attributes {dimension_semantics = [#tpu.dimension_semantics<parallel>, #tpu.dimension_semantics<arbitrary>], iteration_bounds = array<i64: 2, 1>, scalar_prefetch = 0 : i64, scratch_operands = 0 : i64, tpu.core_type = #tpu.core_type<tc>, window_params = [{transform_indices = @transform_0, window_bounds = array<i64: 1, 4, 256>}, {transform_indices = @transform_1, window_bounds = array<i64: 1, 1, 256>}, {transform_indices = @transform_2, window_bounds = array<i64: 1, 2, 256>}]} {
    %c0_i32 = arith.constant 0 : i32
    %0 = arith.cmpi eq, %arg1, %c0_i32 : i32
    %1 = arith.extui %0 : i1 to i32
    %c0_i32_0 = arith.constant 0 : i32
    %2 = arith.cmpi ne, %1, %c0_i32_0 : i32
    scf.if %2 {
      %cst_16 = arith.constant 0.000000e+00 : f32
      %36 = vector.broadcast %cst_16 : f32 to vector<2x256xf32>
      %c0_17 = arith.constant 0 : index
      %c0_18 = arith.constant 0 : index
      %c0_19 = arith.constant 0 : index
      %37 = vector.load %arg4[%c0_17, %c0_18, %c0_19] : memref<1x2x256xf32, #tpu.memory_space<vmem>>, vector<1x2x256xf32>
      %38 = vector.shape_cast %37 : vector<1x2x256xf32> to vector<2x256xf32>
      %39 = vector.shape_cast %36 : vector<2x256xf32> to vector<1x2x256xf32>
      tpu.vector_store %arg4[%c0_17, %c0_18, %c0_19], %39 {strides = array<i32>} : memref<1x2x256xf32, #tpu.memory_space<vmem>>, vector<1x2x256xf32>,
    } else {
    }
    %c0 = arith.constant 0 : index
    %c0_1 = arith.constant 0 : index
    %c0_2 = arith.constant 0 : index
    %3 = vector.load %arg2[%c0, %c0_1, %c0_2] : memref<1x4x256xf32, #tpu.memory_space<vmem>>, vector<1x4x256xf32>
    %4 = vector.shape_cast %3 : vector<1x4x256xf32> to vector<4x256xf32>
    %c0_3 = arith.constant 0 : index
    %c0_4 = arith.constant 0 : index
    %c0_5 = arith.constant 0 : index
    %5 = vector.load %arg3[%c0_3, %c0_4, %c0_5] : memref<1x1x256xi32, #tpu.memory_space<vmem>>, vector<1x1x256xi32>
    %6 = vector.shape_cast %5 : vector<1x1x256xi32> to vector<1x256xi32>
    %cst = arith.constant dense<0xFF800000> : vector<256xf32>
    %7 = vector.multi_reduction <maximumf>, %4, %cst [0] : vector<4x256xf32> to vector<256xf32>
    %8 = vector.shape_cast %7 : vector<256xf32> to vector<1x256xf32>
    %9 = vector.broadcast %8 : vector<1x256xf32> to vector<4x256xf32>
    %10 = arith.subf %4, %9 : vector<4x256xf32>
    %11 = math.exp %10 : vector<4x256xf32>
    %cst_6 = arith.constant dense<0.000000e+00> : vector<256xf32>
    %12 = vector.multi_reduction <add>, %11, %cst_6 [0] : vector<4x256xf32> to vector<256xf32>
    %13 = vector.shape_cast %12 : vector<256xf32> to vector<1x256xf32>
    %14 = tpu.iota {dimensions = array<i32: 0>} : vector<4x256xi32>
    %15 = vector.broadcast %6 : vector<1x256xi32> to vector<4x256xi32>
    %16 = arith.cmpi eq, %15, %14 : vector<4x256xi32>
    %cst_7 = arith.constant 0.000000e+00 : f32
    %17 = vector.broadcast %cst_7 : f32 to vector<4x256xf32>
    %18 = arith.select %16, %11, %17 : vector<4x256xi1>, vector<4x256xf32>
    %cst_8 = arith.constant dense<0.000000e+00> : vector<256xf32>
    %19 = vector.multi_reduction <add>, %18, %cst_8 [0] : vector<4x256xf32> to vector<256xf32>
    %20 = vector.shape_cast %19 : vector<256xf32> to vector<1x256xf32>
    %21 = tpu.reciprocal %13 : vector<1x256xf32> -> vector<1x256xf32>
    %22 = arith.mulf %20, %21 : vector<1x256xf32>
    %c255_i32 = arith.constant 255 : i32
    %23 = vector.broadcast %c255_i32 : i32 to vector<1x256xi32>
    %24 = arith.cmpi ne, %6, %23 : vector<1x256xi32>
    %cst_9 = arith.constant 0.000000e+00 : f32
    %25 = vector.broadcast %cst_9 : f32 to vector<1x256xf32>
    %26 = arith.select %24, %22, %25 : vector<1x256xi1>, vector<1x256xf32>
    %27 = arith.extui %24 : vector<1x256xi1> to vector<1x256xi32>
    %28 = arith.sitofp %27 : vector<1x256xi32> to vector<1x256xf32>
    %c0_10 = arith.constant 0 : index
    %c0_11 = arith.constant 0 : index
    %c0_12 = arith.constant 0 : index
    %29 = vector.load %arg4[%c0_10, %c0_11, %c0_12] : memref<1x2x256xf32, #tpu.memory_space<vmem>>, vector<1x2x256xf32>
    %30 = vector.shape_cast %29 : vector<1x2x256xf32> to vector<2x256xf32>
    %31 = tpu.concatenate %26, %28 in 0 : vector<1x256xf32>, vector<1x256xf32> -> vector<2x256xf32>
    %32 = arith.addf %30, %31 : vector<2x256xf32>
    %c0_13 = arith.constant 0 : index
    %c0_14 = arith.constant 0 : index
    %c0_15 = arith.constant 0 : index
    %33 = vector.load %arg4[%c0_13, %c0_14, %c0_15] : memref<1x2x256xf32, #tpu.memory_space<vmem>>, vector<1x2x256xf32>
    %34 = vector.shape_cast %33 : vector<1x2x256xf32> to vector<2x256xf32>
    %35 = vector.shape_cast %32 : vector<2x256xf32> to vector<1x2x256xf32>
    tpu.vector_store %arg4[%c0_13, %c0_14, %c0_15], %35 {strides = array<i32>} : memref<1x2x256xf32, #tpu.memory_space<vmem>>, vector<1x2x256xf32>,
    return
  }
  func.func @transform_0(%arg0: i32, %arg1: i32) -> (i32, i32, i32) {
    %c0_i32 = arith.constant 0 : i32
    %c0_i32_0 = arith.constant 0 : i32
    return %arg0, %c0_i32, %arg1 : i32, i32, i32
  }
  func.func @transform_1(%arg0: i32, %arg1: i32) -> (i32, i32, i32) {
    %c0_i32 = arith.constant 0 : i32
    %c0_i32_0 = arith.constant 0 : i32
    return %arg0, %c0_i32, %arg1 : i32, i32, i32
  }
  func.func @transform_2(%arg0: i32, %arg1: i32) -> (i32, i32, i32) {
    %c0_i32 = arith.constant 0 : i32
    %c0_i32_0 = arith.constant 0 : i32
    %c0_i32_1 = arith.constant 0 : i32
    return %arg0, %c0_i32, %c0_i32_0 : i32, i32, i32
  }
}

</mosaic_0001>

<bundles_post_ra>
// kernel: tpu_custom_call.1
= control target key start
LH: loop header
LB: loop body
LE: loop exit
PB: predicated region body
PF: predicated region fallthrough
CT: control target
= control target key end

     0   :  { %7 = vsyncpa [#allocation3], 0  ;;  %s947_s0 = inlined_call_operand.hbm [shape: f32[2,4,256], index: 0, kind: input, shape index: {}]   ;;  %s948_s1 = inlined_call_operand.hbm [shape: s32[2,1,256], index: 1, kind: input, shape index: {}]   ;;  %s949_s2 = inlined_call_operand.hbm [shape: f32[2,2,256], index: 2, kind: output, shape index: {}]  }
   0x1   :  { %9 = vsyncpa [#allocation3 + $0x1], 0 }
   0x2   :  { %10 = vsyncpa [#allocation6], 0 }
   0x3   :  { %12 = vsyncpa [#allocation6 + $0x1], 0 }
   0x4   :  { %13 = vsyncpa [#allocation4], 0 }
   0x5   :  { %15 = vsyncpa [#allocation4 + $0x1], 0  ;;  %s747_s9 = smov 0   ;;  %s749_s10 = smov 0  }
   0x6   :  { %s751_s11 = smov 0   ;;  %s753_s12 = smov 0  }
   0x7   :  { %s755_s13 = smov 0   ;;  %s757_s14 = smov 0  }
   0x8 LB: > { %s484_s15 = sadd.s32 4294967295, %s724_s14   ;;  %s485_s16 = sadd.s32 4294967294, %s724_s14   ;;  %s724_s14 = sphi %s757_s14, %s21_s14   ;;  %s720_s13 = sphi %s755_s13, %s961_s13   ;;  %s716_s12 = sphi %s753_s12, %s960_s12   ;;  %s712_s11 = sphi %s751_s11, %s959_s11   ;;  %s708_s10 = sphi %s749_s10, %s958_s10   ;;  %s704_s9 = sphi %s747_s9, %s957_s9  }
   0x9   : > { %s33_s17 = sadd.s32 1, %s720_s13  ;;  %s42_s18 = sadd.s32 1, %s712_s11 }
   0xa   : > { %p35_p0 = scmp.ge.s32.totalorder %s33_s17, 2  ;;  %p49_p1 = scmp.ne.s32.totalorder %s712_s11, %s708_s10 }
   0xb   : > { %p50_p2 = scmp.eq.s32.totalorder %s724_s14, 0  ;;  %p55_p3 = scmp.ne.s32.totalorder %s708_s10, %s704_s9 }
   0xc   : > { %s963_s17 = smov (%p35_p0, %s33_s17), 0  ;;  %p56_p5 = scmp.eq.s32.totalorder %s484_s15, 0 }
   0xd   : > { %p788_p4 = por %p50_p2, %p49_p1  ;;  %s37_s20 = ssub.s32 %s720_s13, %s963_s17 }
   0xe   : > { %p107_p6 = scmp.eq.s32.totalorder %s484_s15, 1  ;;  %p40_p7 = scmp.eq.s32.totalorder %s37_s20, 0 }
   0xf   : > { %p794_p8 = por %p56_p5, %p55_p3  ;;  %p113_p10 = scmp.eq.s32.totalorder %s485_s16, 1 }
  0x10   : > { %p798_p9 = por %p107_p6, %p49_p1  ;;  %p524_p13 = scmp.lt.s32.totalorder %s724_s14, 2 }
  0x11   : > { %s803_s23 = scalar_select %p40_p7, %s712_s11, %s42_s18  }
  0x12   : > { %p805_p11 = por %p113_p10, %p55_p3  ;;  %s812_s25 = sand.u32 1, %s712_s11  }
  0x13   : > { %s488_s26 = sshll.u32 %s812_s25, 3  ;;  %s504_s27 = sshll.u32 %s720_s13, 7 }
  0x14   : > { %s145_s30 = scalar_lea.hbm %s947_s0, %s504_s27  ;;  %s137_s3 = scalar_lea.vmem [#allocation2], %s488_s26 }
  0x15   : > { %s147_s4 = sshll.u32 %s137_s3, 4  ;;  %p821_p0 = pnand %p524_p13, %p788_p4  ;;  %s148_s4 = int_to_ptr.vmem [resolvable:$true] %s147_s4 }
  0x16   : > { %p494_p1 = scmp.ge.s32.totalorder %s724_s14, 1  ;;  %p173_p2 = scmp.lt.s32.totalorder %s724_s14, 3 }
  0x17   : > { %s134_s6 = scalar_lea.sflag [#allocation3], %s812_s25  ;;  %p586_p3 = pneg %p821_p0 }
  0x18   : > { %s597_s7 = scalar_lea.vmem %s148_s4, 128  ;;  %s726_s8 = smov [#allocation2]  }
  0x19   : > { %p598_p5 = scmp.ne.s32.totalorder %s148_s4, %s597_s7  ;;  %s602_s15 = sshll.u32 %s726_s8, 4  ;;  %s603_s15 = int_to_ptr.vmem [resolvable:$false] %s602_s15 }
  0x1a   : > { %s604_s16 = scalar_lea.vmem %s603_s15, 256  ;;  %p605_p4 = scmp.lt.s32.totalorder %s148_s4, %s603_s15 }
  0x1b   : > { %p600_p6 = pnand %p598_p5, %p586_p3  ;;  %p606_p10 = scmp.lt.s32.totalorder %s604_s16, %s597_s7 }
  0x1d   : > { %p601_p7 = pneg %p600_p6  ;;  %p607_p13 = por %p606_p10, %p605_p4 }
  0x1f   : > { %p608_p12 = pnand %p607_p13, %p601_p7 }
  0x21   : > { %611 = shalt.err (!%p608_p12)
}
  0x22   : > { %516 = dma.hbm_to_vmem [thread:$0]  (!%p821_p0), %s145_s30, 128, %s148_s4, %s134_s6  }
  0x23   : > { %p839_p5 = pnand %p494_p1, %p173_p2  ;;  %s491_s19 = sshll.u32 %s812_s25, 1 }
  0x24   : > { %s505_s20 = sshll.u32 %s720_s13, 5  ;;  %s158_s29 = scalar_lea.vmem [#allocation5], %s491_s19 }
  0x25   : > { %s166_s28 = scalar_lea.hbm %s948_s1, %s505_s20  ;;  %s168_s3 = sshll.u32 %s158_s29, 4  ;;  %s169_s3 = int_to_ptr.vmem [resolvable:$true] %s168_s3 }
  0x26   : > { %s155_s7 = scalar_lea.sflag [#allocation6], %s812_s25  ;;  %s625_s8 = scalar_lea.vmem %s169_s3, 32 }
  0x27   : > { %p626_p12 = scmp.ne.s32.totalorder %s169_s3, %s625_s8  ;;  %s727_s30 = smov [#allocation5]  }
  0x28   : > { %s630_s4 = sshll.u32 %s727_s30, 4  ;;  %s631_s4 = int_to_ptr.vmem [resolvable:$false] %s630_s4 }
  0x29   : > { %p628_p6 = pnand %p626_p12, %p586_p3  ;;  %s632_s6 = scalar_lea.vmem %s631_s4, 64 }
  0x2a   : > { %p633_p1 = scmp.lt.s32.totalorder %s169_s3, %s631_s4  ;;  %p634_p2 = scmp.lt.s32.totalorder %s632_s6, %s625_s8 }
  0x2b   : > { %p629_p7 = pneg %p628_p6 }
  0x2c   : > { %p635_p4 = por %p634_p2, %p633_p1 }
  0x2e   : > { %p636_p10 = pnand %p635_p4, %p629_p7 }
  0x30   : > { %639 = shalt.err (!%p636_p10)
}
  0x31   : > { %519 = dma.hbm_to_vmem [thread:$0]  (!%p821_p0), %s166_s28, 32, %s169_s3, %s155_s7  }
  0x32   : > { %177 = sbr.rel (%p839_p5) target bundleno = 155 (0x9b), region = 28  ;;  %s857_s25 = sand.u32 (!%p839_p5), 1, %s708_s10  }
  0x33   : > { %s495_s15 = sshll.u32 (!%p839_p5), %s857_s25, 3  ;;  %s180_s16 = scalar_lea.sflag (!%p839_p5), [#allocation3], %s857_s25 }
  0x34   : > { %s183_s19 = scalar_lea.vmem (!%p839_p5), [#allocation2], %s495_s15 }
  0x37   : > { %691 = dma.done.wait (%p794_p8), %s180_s16, 128  }
  0x38   : > { %693 = vsyncadd (%p794_p8), %s180_s16, 4294967168  ;;  %s496_s5 = sshll.u32 %s857_s25, 1  ;;  %s189_s18 = scalar_lea.sflag [#allocation6], %s857_s25 }
  0x39   : > { %s867_s20 = scalar_lea.vmem [#allocation5], %s496_s5 }
  0x3a   : > { %695 = dma.done.wait (%p794_p8), %s189_s18, 32  }
  0x3b   : > { %697 = vsyncadd (%p794_p8), %s189_s18, 4294967264  ;;  %s497_s26 = sshll.u32 %s857_s25, 2  ;;  %v728_v0 = vmov 0.0   ;;  %vm230_vm0 = vcmask 1043456   ;;  %v225_v1 = vld [vmem:[%s183_s19] sm:$0xff]  ;;  %v269_v18 = vlaneseq  ;;  %vm346_vm4 = vcmask 1040384  }
  0x3c   : > { %s874_s27 = scalar_lea.vmem [#allocation7], %s497_s26  ;;  %v228_v2 = vcombine.high %v225_v1, %v225_v1  ;;  %v231_v3 = vsel %vm230_vm0, %v225_v1, -inf  ;;  %v226_v23 = vld [vmem:[%s867_s20] sm:$0x3]  ;;  %v729_v57 = vmov 1966171168  }
  0x3d   : > { %224 = vst [vmem:[%s874_s27] sm:$0xf] %v728_v0  ;;  %v232_v4 = vrot.slane %v231_v3, 4  ;;  %v880_v21 = vshrl.u32 %v269_v18, 7  ;;  %v306_v58 = vunpack.c.l.s4 %v729_v57  ;;  %vm301_vm3 = vcmp.ne.s32.totalorder %v226_v23, 255  ;;  %s506_s21 = sshll.u32 %s716_s12, 6  ;;  %s377_s28 = sshll.u32 %s874_s27, 4  ;;  %s378_s28 = int_to_ptr.vmem [resolvable:$true] %s377_s28 }
  0x3e   : > { %v238_v5 = vsel %vm230_vm0, %v228_v2, -inf  ;;  %s375_s7 = scalar_lea.hbm %s949_s2, %s506_s21  ;;  %s363_s8 = scalar_lea.sflag [#allocation4], %s857_s25 }
  0x3f   : > { %v233_v6 = vmax.f32 %v231_v3, %v232_v4  ;;  %v239_v7 = vrot.slane %v238_v5, 4  ;;  %v883_v22 = vsub.s32 0, %v880_v21  ;;  %v887_v24 = vsub.s32 1, %v880_v21  ;;  %s640_s30 = scalar_lea.vmem %s378_s28, 64  ;;  %s731_s4 = smov [#allocation7]  }
  0x40   : > { %v307_v61 = vunpack.c.0.s8 %v306_v58  ;;  %p641_p8 = scmp.ne.s32.totalorder %s378_s28, %s640_s30  ;;  %s644_s6 = sshll.u32 %s731_s4, 4  ;;  %s645_s6 = int_to_ptr.vmem [resolvable:$false] %s644_s6 }
  0x41   : > { %v234_v8 = vrot.slane %v233_v6, 2  ;;  %v240_v9 = vmax.f32 %v238_v5, %v239_v7  ;;  %v274_v25 = vrot.slane %v226_v23, %v883_v22  ;;  %v278_v26 = vrot.slane %v226_v23, %v887_v24  ;;  %s646_s15 = scalar_lea.vmem %s645_s6, 128  ;;  %p647_p13 = scmp.lt.s32.totalorder %s378_s28, %s645_s6 }
  0x42   : > { %v310_v3 = vsub.s32 %v307_v61, %v880_v21  ;;  %v730_v5 = vmov 1983009808   ;;  %p642_p0 = pnand %p641_p8, %p798_p9  ;;  %p648_p5 = scmp.lt.s32.totalorder %s646_s15, %s640_s30 }
  0x43   : > { %v235_v10 = vmax.f32 %v233_v6, %v234_v8  ;;  %v241_v11 = vrot.slane %v240_v9, 2  ;;  %vm279_vm1 = vcmp.eq.s32.totalorder %v274_v25, %v880_v21  ;;  %vm280_vm2 = vcmp.eq.s32.totalorder %v278_v26, %v880_v21 }
  0x44   : > { %v353_v6 = vunpack.c.l.s4 %v730_v5  ;;  %v498_v8 = vsel %vm301_vm3, 1.0, %v728_v0  ;;  %p643_p3 = pneg %p642_p0  ;;  %p649_p12 = por %p648_p5, %p647_p13 }
  0x45   : > { %v236_v12 = vrot.slane %v235_v10, 1  ;;  %v242_v13 = vmax.f32 %v240_v9, %v241_v11  ;;  %v339_v11 = vrot.slane %v498_v8, %v883_v22 }
  0x46   : > { %p650_p6 = pnand %p649_p12, %p643_p3 }
  0x47   : > { %v237_v14 = vmax.f32 %v235_v10, %v236_v12  ;;  %v243_v15 = vrot.slane %v242_v13, 1  ;;  %v354_v10 = vunpack.c.0.s8 %v353_v6  ;;  %v343_v12 = vrot.slane %v498_v8, %v887_v24 }
  0x49   : > { %v244_v16 = vmax.f32 %v242_v13, %v243_v15 }
  0x4b   : > { %v247_v17 = vcombine.low %v237_v14, %v244_v16  ;;  %v357_v16 = vsub.s32 %v354_v10, %v880_v21 }
  0x4d   : > { %v249_v19 = vsub.f32 %v225_v1, %v247_v17 }
  0x4f   : > { %v250_v20 = vmul.f32 1.442695, %v249_v19  ;;  %v323_v19 = vld [vmem:[%s874_s27] sm:$0xf] }
  0x51   : > { %578 = vpow2.f32 %v250_v20 }
  0x5e   : > { %v579_v27 = vpop.eup %578 }
  0x5f   : > { %v253_v28 = vcombine.high %v579_v27, %v579_v27  ;;  %v255_v29 = vsel %vm230_vm0, %v579_v27, 0.0  ;;  %v281_v30 = vsel %vm279_vm1, %v579_v27, 0.0 }
  0x60   : > { %v256_v31 = vrot.slane %v255_v29, 4  ;;  %v283_v32 = vsel %vm230_vm0, %v281_v30, 0.0 }
  0x61   : > { %v262_v33 = vsel %vm230_vm0, %v253_v28, 0.0  ;;  %v282_v34 = vsel %vm280_vm2, %v253_v28, 0.0  ;;  %v284_v37 = vrot.slane %v283_v32, 4 }
  0x62   : > { %v257_v35 = vadd.f32 %v256_v31, %v255_v29  ;;  %v263_v36 = vrot.slane %v262_v33, 4  ;;  %v290_v38 = vsel %vm230_vm0, %v282_v34, 0.0 }
  0x63   : > { %v291_v41 = vrot.slane %v290_v38, 4  ;;  %v285_v44 = vadd.f32 %v284_v37, %v283_v32 }
  0x64   : > { %v258_v39 = vrot.slane %v257_v35, 2  ;;  %v264_v40 = vadd.f32 %v263_v36, %v262_v33 }
  0x65   : > { %v292_v47 = vadd.f32 %v291_v41, %v290_v38  ;;  %v286_v50 = vrot.slane %v285_v44, 2 }
  0x66   : > { %v259_v42 = vadd.f32 %v258_v39, %v257_v35  ;;  %v265_v43 = vrot.slane %v264_v40, 2 }
  0x67   : > { %v293_v52 = vrot.slane %v292_v47, 2  ;;  %v287_v53 = vadd.f32 %v286_v50, %v285_v44 }
  0x68   : > { %v260_v45 = vrot.slane %v259_v42, 1  ;;  %v266_v46 = vadd.f32 %v265_v43, %v264_v40 }
  0x69   : > { %v294_v54 = vadd.f32 %v293_v52, %v292_v47  ;;  %v288_v55 = vrot.slane %v287_v53, 1 }
  0x6a   : > { %v261_v48 = vadd.f32 %v260_v45, %v259_v42  ;;  %v267_v49 = vrot.slane %v266_v46, 1 }
  0x6b   : > { %v295_v56 = vrot.slane %v294_v54, 1  ;;  %v289_v59 = vadd.f32 %v288_v55, %v287_v53 }
  0x6c   : > { %v268_v51 = vadd.f32 %v267_v49, %v266_v46  ;;  %580 = vrcp.f32 %v261_v48 }
  0x6d   : > { %v296_v60 = vadd.f32 %v295_v56, %v294_v54 }
  0x6e   : > { %582 = vrcp.f32 %v268_v51 }
  0x79   : > { %v581_v62 = vpop.eup %580 }
  0x7a   : > { %v299_v63 = vmul.f32 %v581_v62, %v289_v59 }
  0x7b   : > { %v583_v1 = vpop.eup %582 }
  0x7c   : > { %v300_v2 = vmul.f32 %v583_v1, %v296_v60 }
  0x7e   : > { %v304_v4 = vcombine.low %v299_v63, %v300_v2 }
  0x80   : > { %v311_v7 = vrot.slane %v304_v4, %v310_v3 }
  0x82   : > { %v318_v9 = vrot.slane %v311_v7, %v310_v3 }
  0x84   : > { %v320_v13 = vsel %vm301_vm3, %v318_v9, 0.0 }
  0x85   : > { %v328_v14 = vrot.slane %v320_v13, %v883_v22  ;;  %v332_v15 = vrot.slane %v320_v13, %v887_v24 }
  0x87   : > { %v347_v17 = vsel %vm346_vm4, %v328_v14, %v339_v11  ;;  %v348_v18 = vsel %vm346_vm4, %v332_v15, %v343_v12 }
  0x88   : > { %v351_v0 = vcombine.low %v347_v17, %v348_v18 }
  0x8a   : > { %v358_v20 = vrot.slane %v351_v0, %v357_v16 }
  0x8c   : > { %v360_v23 = vadd.f32 %v358_v20, %v323_v19 }
  0x8e   : > { %361 = vst [vmem:[%s874_s27] sm:$0xf] %v360_v23 }
  0x8f   : > { %653 = shalt.err (!%p650_p6)
}
  0x90   : > { %s654_s12 = scalar_lea.hbm %s375_s7, 64  ;;  %s658_s19 = scalar_lea.hbm %s949_s2, 128 }
  0x91   : > { %p655_p7 = scmp.ne.s32.totalorder %s375_s7, %s654_s12  ;;  %p659_p4 = scmp.lt.s32.totalorder %s375_s7, %s949_s2 }
  0x92   : > { %p660_p10 = scmp.lt.s32.totalorder %s658_s19, %s654_s12 }
  0x93   : > { %p656_p1 = pnand %p655_p7, %p798_p9 }
  0x94   : > { %p661_p8 = por %p660_p10, %p659_p4 }
  0x95   : > { %p657_p2 = pneg %p656_p1 }
  0x97   : > { %p662_p0 = pnand %p661_p8, %p657_p2 }
  0x99   : > { %665 = shalt.err (!%p662_p0)
}
  0x9a   : > { %511 = dma.vmem_to_hbm [thread:$0]  (%p798_p9), %s378_s28, 64, %s375_s7, %s363_s8  }
  0x9b PF: > { %s389_s20 = sand.u32 1, %s704_s9   ;;  %p956_p3 = scmp.ge.s32.totalorder %s724_s14, 2 }
  0x9c   : > { %s390_s26 = scalar_lea.sflag [#allocation4], %s389_s20 }
  0x9d   : > { %p521_p13 = pnand %p956_p3, %p805_p11 }
  0x9f   : > { %p522_p5 = pneg %p521_p13 }
  0xa1   : > { %699 = dma.done.wait (%p522_p5), %s390_s26, 64  }
  0xa2   : > { %701 = vsyncadd (%p522_p5), %s390_s26, 4294967232  ;;  %s21_s14 = sadd.s32 1, %s724_s14   ;;  %s957_s9 = smov %s708_s10 }
  0xa3   : > { %p18_p12 = scmp.ge.s32.totalorder %s21_s14, 4   ;;  %s958_s10 = smov %s712_s11 }
  0xa4   : > { %s959_s11 = smov %s803_s23  ;;  %s960_s12 = smov %s720_s13 }
  0xa5   : > { %s961_s13 = smov %s963_s17  ;;  %20 = sbr.rel (!%p18_p12) target bundleno = 8 (0x8), region = 90 }
  0xaa   :  { %395 = vsyncpa [#allocation3], 1 }
  0xab   :  { %397 = vsyncpa [#allocation3 + $0x1], 1 }
  0xac   :  { %398 = vsyncpa [#allocation6], 1 }
  0xad   :  { %400 = vsyncpa [#allocation6 + $0x1], 1 }
  0xae   :  { %401 = vsyncpa [#allocation4], 1 }
  0xaf   :  { %403 = vsyncpa [#allocation4 + $0x1], 1 }

</bundles_post_ra>
